<compile_context>
chip_gen: v7x
topology: tpu7x:2x2x1
jax: 0.10.0
libtpu: 0.0.40
codegen_flags: <defaults>
</compile_context>

<pallas_src>
import jax
import jax.numpy as jnp
from jax.experimental import pallas as pl
from jax.experimental.pallas import tpu as pltpu

HIDDEN = 256


def critic_adv_kernel(state_ref, action_ref, w1s_ref, w1a_ref, b1_ref,
                      w2_ref, b2_ref, w3_ref, b3_ref, out_ref):
    # ---- Layer 1: state @ W1s + action @ W1a + b1  (== cat[state, action] @ W1 + b1), ReLU.
    # bf16 operands on the MXU, f32 accumulation; bias + ReLU in f32.
    h1 = jnp.dot(state_ref[...].astype(jnp.bfloat16), w1s_ref[...],
                 preferred_element_type=jnp.float32)
    h1 = h1 + jnp.dot(action_ref[...].astype(jnp.bfloat16), w1a_ref[...],
                      preferred_element_type=jnp.float32)
    h1 = jnp.maximum(h1 + b1_ref[...], 0.0)

    # ---- Layer 2: (B, 256) @ (256, 256) + b2, ReLU.  bf16 MXU, f32 accumulate.
    h2 = jnp.dot(h1.astype(jnp.bfloat16), w2_ref[...],
                 preferred_element_type=jnp.float32)
    h2 = jnp.maximum(h2 + b2_ref[...], 0.0)

    # ---- Layer 3: (256 -> 1) as a VPU multiply + lane reduction (f32).
    # An MXU matmul with N=1 would pad the output tile to 128/256 lanes and waste
    # the array; the VPU/XLU slots are otherwise idle here.
    out_ref[...] = jnp.sum(h2 * w3_ref[...], axis=-1, keepdims=True) + b3_ref[...]


def init_critic_params(key, state_dim, action_dim, hidden=HIDDEN):
    """PyTorch-style U[-1/sqrt(fan_in), 1/sqrt(fan_in)] init; weights stored bf16,
    pre-transposed to (in, out), with W1 split into state/action halves."""
    ks = jax.random.split(key, 6)

    def uniform(k, shape, fan_in):
        bound = 1.0 / jnp.sqrt(jnp.float32(fan_in))
        return jax.random.uniform(k, shape, jnp.float32, -bound, bound)

    in_dim = state_dim + action_dim
    w1_t = uniform(ks[0], (in_dim, hidden), in_dim)      # (S+A, 256)
    b1 = uniform(ks[1], (1, hidden), in_dim)
    w2_t = uniform(ks[2], (hidden, hidden), hidden)      # (256, 256)
    b2 = uniform(ks[3], (1, hidden), hidden)
    w3_row = uniform(ks[4], (1, hidden), hidden)         # l3.weight as a (1, 256) row
    b3 = uniform(ks[5], (1, 1), hidden)

    # Split W1 along the input axis so the kernel never needs concat([state, action]).
    w1s_t = w1_t[:state_dim].astype(jnp.bfloat16)        # (S, 256)
    w1a_t = w1_t[state_dim:].astype(jnp.bfloat16)        # (A, 256)
    return (w1s_t, w1a_t, b1, w2_t.astype(jnp.bfloat16), b2, w3_row, b3)


def critic_adv_forward(state, action, params, *, block_b=1024):
    """Fused CriticAdv forward. Small batches: one grid-less call with everything in
    VMEM. Large batches: 1-D grid over batch rows with VMEM-resident weights."""
    w1s, w1a, b1, w2, b2, w3, b3 = params
    state = state.astype(jnp.float32)
    action = action.astype(jnp.float32)
    B, S = state.shape
    A = action.shape[1]
    H = w2.shape[0]
    args = (state, action, w1s, w1a, b1, w2, b2, w3, b3)

    if B <= block_b:
        # Inference-sized batch: fixed per-call overhead dominates; single block, no grid.
        vmem = pl.BlockSpec(memory_space=pltpu.MemorySpace.VMEM)
        return pl.pallas_call(
            critic_adv_kernel,
            out_shape=jax.ShapeDtypeStruct((B, 1), jnp.float32),
            in_specs=[vmem] * 9,
            out_specs=vmem,
        )(*args)

    # Training-sized batch: grid over batch rows, double-buffered activation stream,
    # weights pinned in VMEM via constant index maps (no re-DMA per step).
    num_blocks = pl.cdiv(B, block_b)
    Bp = num_blocks * block_b
    if Bp != B:  # rare for RL batch sizes; pad so every block is full.
        state = jnp.pad(state, ((0, Bp - B), (0, 0)))
        action = jnp.pad(action, ((0, Bp - B), (0, 0)))
        args = (state, action, w1s, w1a, b1, w2, b2, w3, b3)

    row = lambda i: (i, 0)     # activation / output blocks march down the batch
    const = lambda i: (0, 0)   # weights: same block every step -> stay VMEM-resident

    # TODO(synk): a lane-dense (1, block_b) output (batch on lanes) would replace the
    # block_b/8 masked vst.msk stores with full-lane stores, but it requires a
    # sublane->lane relayout of the per-row Q values that Mosaic does not reliably
    # lower; keeping the robust (block_b, 1) store.
    out = pl.pallas_call(
        critic_adv_kernel,
        out_shape=jax.ShapeDtypeStruct((Bp, 1), jnp.float32),
        grid=(num_blocks,),
        in_specs=[
            pl.BlockSpec((block_b, S), row),    # state rows
            pl.BlockSpec((block_b, A), row),    # action rows
            pl.BlockSpec((S, H), const),        # W1 (state half), bf16
            pl.BlockSpec((A, H), const),        # W1 (action half), bf16
            pl.BlockSpec((1, H), const),        # b1, f32
            pl.BlockSpec((H, H), const),        # W2, bf16
            pl.BlockSpec((1, H), const),        # b2, f32
            pl.BlockSpec((1, H), const),        # W3 row, f32
            pl.BlockSpec((1, 1), const),        # b3, f32
        ],
        out_specs=pl.BlockSpec((block_b, 1), row),
        compiler_params=pltpu.CompilerParams(
            dimension_semantics=("parallel",)),  # shard batch blocks across TCs (v7x)
    )(*args)
    return out[:B]


def critic_adv_reference(state, action, params):
    """Pure-JAX f32 reference mirroring the PyTorch forward (same bf16-stored weights)."""
    w1s, w1a, b1, w2, b2, w3, b3 = params
    w1 = jnp.concatenate([w1s, w1a], axis=0).astype(jnp.float32)
    sa = jnp.concatenate([state.astype(jnp.float32), action.astype(jnp.float32)], axis=1)
    h1 = jax.nn.relu(sa @ w1 + b1)
    h2 = jax.nn.relu(h1 @ w2.astype(jnp.float32) + b2)
    return h2 @ w3.T + b3


if __name__ == "__main__":
    S, A = 8, 4
    key = jax.random.PRNGKey(0)
    k_params, k_s, k_a, k_sb, k_ab = jax.random.split(key, 5)
    params = init_critic_params(k_params, S, A)

    # Small (inference-sized) batch: grid-less path.
    B = 2
    state = jax.random.normal(k_s, (B, S), jnp.float32)
    action = jax.random.normal(k_a, (B, A), jnp.float32)
    q1 = jax.block_until_ready(critic_adv_forward(state, action, params))
    q1_ref = critic_adv_reference(state, action, params)
    assert q1.shape == (B, 1), q1.shape
    assert jnp.allclose(q1, q1_ref, atol=2e-2, rtol=2e-2), (q1, q1_ref)

    # Training-sized batch: exercises the batched grid path (weights VMEM-resident).
    Bb = 2048
    state_b = jax.random.normal(k_sb, (Bb, S), jnp.float32)
    action_b = jax.random.normal(k_ab, (Bb, A), jnp.float32)
    qb = jax.block_until_ready(critic_adv_forward(state_b, action_b, params))
    qb_ref = critic_adv_reference(state_b, action_b, params)
    assert qb.shape == (Bb, 1), qb.shape
    assert jnp.allclose(qb, qb_ref, atol=2e-2, rtol=2e-2)

    print("KERNEL_OK")
</pallas_src>

<mosaic_0001>
module attributes {stable_mosaic.version = 11 : i64} {
  func.func @critic_adv_kernel(%arg0: memref<2x8xf32, #tpu.memory_space<vmem>>, %arg1: memref<2x4xf32, #tpu.memory_space<vmem>>, %arg2: memref<8x256xbf16, #tpu.memory_space<vmem>>, %arg3: memref<4x256xbf16, #tpu.memory_space<vmem>>, %arg4: memref<1x256xf32, #tpu.memory_space<vmem>>, %arg5: memref<256x256xbf16, #tpu.memory_space<vmem>>, %arg6: memref<1x256xf32, #tpu.memory_space<vmem>>, %arg7: memref<1x256xf32, #tpu.memory_space<vmem>>, %arg8: memref<1x1xf32, #tpu.memory_space<vmem>>, %arg9: memref<2x1xf32, #tpu.memory_space<vmem>>) attributes {dimension_semantics = [], scalar_prefetch = 0 : i64, scratch_operands = 0 : i64, tpu.core_type = #tpu.core_type<tc>} {
    %c0 = arith.constant 0 : index
    %c0_0 = arith.constant 0 : index
    %0 = vector.load %arg0[%c0, %c0_0] : memref<2x8xf32, #tpu.memory_space<vmem>>, vector<2x8xf32>
    %1 = arith.truncf %0 : vector<2x8xf32> to vector<2x8xbf16>
    %c0_1 = arith.constant 0 : index
    %c0_2 = arith.constant 0 : index
    %2 = vector.load %arg2[%c0_1, %c0_2] : memref<8x256xbf16, #tpu.memory_space<vmem>>, vector<8x256xbf16>
    %cst = arith.constant dense<0.000000e+00> : vector<2x256xf32>
    %3 = tpu.matmul %1, %2, %cst {dimension_numbers = #tpu.dot_dimension_numbers<[1], [0], [0], [1], [0, 0, 1, 1], [], []>} : vector<2x8xbf16>, vector<8x256xbf16>, vector<2x256xf32> -> vector<2x256xf32>
    %c0_3 = arith.constant 0 : index
    %c0_4 = arith.constant 0 : index
    %4 = vector.load %arg1[%c0_3, %c0_4] : memref<2x4xf32, #tpu.memory_space<vmem>>, vector<2x4xf32>
    %5 = arith.truncf %4 : vector<2x4xf32> to vector<2x4xbf16>
    %c0_5 = arith.constant 0 : index
    %c0_6 = arith.constant 0 : index
    %6 = vector.load %arg3[%c0_5, %c0_6] : memref<4x256xbf16, #tpu.memory_space<vmem>>, vector<4x256xbf16>
    %cst_7 = arith.constant dense<0.000000e+00> : vector<2x256xf32>
    %7 = tpu.matmul %5, %6, %cst_7 {dimension_numbers = #tpu.dot_dimension_numbers<[1], [0], [0], [1], [0, 0, 1, 1], [], []>} : vector<2x4xbf16>, vector<4x256xbf16>, vector<2x256xf32> -> vector<2x256xf32>
    %8 = arith.addf %3, %7 : vector<2x256xf32>
    %c0_8 = arith.constant 0 : index
    %c0_9 = arith.constant 0 : index
    %9 = vector.load %arg4[%c0_8, %c0_9] : memref<1x256xf32, #tpu.memory_space<vmem>>, vector<1x256xf32>
    %10 = vector.broadcast %9 : vector<1x256xf32> to vector<2x256xf32>
    %11 = arith.addf %8, %10 : vector<2x256xf32>
    %cst_10 = arith.constant 0.000000e+00 : f32
    %12 = vector.broadcast %cst_10 : f32 to vector<2x256xf32>
    %13 = arith.maximumf %11, %12 : vector<2x256xf32>
    %14 = arith.truncf %13 : vector<2x256xf32> to vector<2x256xbf16>
    %c0_11 = arith.constant 0 : index
    %c0_12 = arith.constant 0 : index
    %15 = vector.load %arg5[%c0_11, %c0_12] : memref<256x256xbf16, #tpu.memory_space<vmem>>, vector<256x256xbf16>
    %cst_13 = arith.constant dense<0.000000e+00> : vector<2x256xf32>
    %16 = tpu.matmul %14, %15, %cst_13 {dimension_numbers = #tpu.dot_dimension_numbers<[1], [0], [0], [1], [0, 0, 1, 1], [], []>} : vector<2x256xbf16>, vector<256x256xbf16>, vector<2x256xf32> -> vector<2x256xf32>
    %c0_14 = arith.constant 0 : index
    %c0_15 = arith.constant 0 : index
    %17 = vector.load %arg6[%c0_14, %c0_15] : memref<1x256xf32, #tpu.memory_space<vmem>>, vector<1x256xf32>
    %18 = vector.broadcast %17 : vector<1x256xf32> to vector<2x256xf32>
    %19 = arith.addf %16, %18 : vector<2x256xf32>
    %cst_16 = arith.constant 0.000000e+00 : f32
    %20 = vector.broadcast %cst_16 : f32 to vector<2x256xf32>
    %21 = arith.maximumf %19, %20 : vector<2x256xf32>
    %c0_17 = arith.constant 0 : index
    %c0_18 = arith.constant 0 : index
    %22 = vector.load %arg7[%c0_17, %c0_18] : memref<1x256xf32, #tpu.memory_space<vmem>>, vector<1x256xf32>
    %23 = vector.broadcast %22 : vector<1x256xf32> to vector<2x256xf32>
    %24 = arith.mulf %21, %23 : vector<2x256xf32>
    %cst_19 = arith.constant dense<0.000000e+00> : vector<2xf32>
    %25 = vector.multi_reduction <add>, %24, %cst_19 [1] : vector<2x256xf32> to vector<2xf32>
    %26 = vector.shape_cast %25 : vector<2xf32> to vector<2x1xf32>
    %c0_20 = arith.constant 0 : index
    %c0_21 = arith.constant 0 : index
    %27 = vector.load %arg8[%c0_20, %c0_21] : memref<1x1xf32, #tpu.memory_space<vmem>>, vector<1x1xf32>
    %28 = vector.broadcast %27 : vector<1x1xf32> to vector<2x1xf32>
    %29 = arith.addf %26, %28 : vector<2x1xf32>
    %c0_22 = arith.constant 0 : index
    %c0_23 = arith.constant 0 : index
    %30 = vector.load %arg9[%c0_22, %c0_23] : memref<2x1xf32, #tpu.memory_space<vmem>>, vector<2x1xf32>
    tpu.vector_store %arg9[%c0_22, %c0_23], %29 {strides = array<i32>} : memref<2x1xf32, #tpu.memory_space<vmem>>, vector<2x1xf32>,
    return
  }
}

</mosaic_0001>

<bundles_post_ra>
// kernel: tpu_custom_call.1
= control target key start
LH: loop header
LB: loop body
LE: loop exit
PB: predicated region body
PF: predicated region fallthrough
CT: control target
= control target key end

     0   :  { %s742_s0 = inlined_call_operand.vmem [shape: f32[2,8], index: 0, kind: input, shape index: {}]   ;;  %s743_s1 = inlined_call_operand.hbm [shape: f32[2,4], index: 1, kind: input, shape index: {}]   ;;  %s744_s2 = inlined_call_operand.vmem [shape: bf16[8,256], index: 2, kind: input, shape index: {}]   ;;  %s745_s3 = inlined_call_operand.vmem [shape: bf16[4,256], index: 3, kind: input, shape index: {}]   ;;  %s746_s4 = inlined_call_operand.vmem [shape: f32[1,256], index: 4, kind: input, shape index: {}]   ;;  %s747_s5 = inlined_call_operand.hbm [shape: bf16[256,256], index: 5, kind: input, shape index: {}]   ;;  %s748_s6 = inlined_call_operand.vmem [shape: f32[1,256], index: 6, kind: input, shape index: {}]   ;;  %s749_s7 = inlined_call_operand.vmem [shape: f32[1,256], index: 7, kind: input, shape index: {}]   ;;  %s750_s8 = inlined_call_operand.<no memory space> [shape: f32[1,1], index: 8, kind: input, shape index: {}]   ;;  %s751_s9 = inlined_call_operand.vmem [shape: f32[2,1], index: 9, kind: output, shape index: {}]  }
   0x1   :  { %v14_v0 = vstv %s750_s8 }
   0x2   :  { %15 = vst [vmem:[#allocation2] sm:$0x1] %v14_v0 }
   0x3   :  { %16 = vsyncpa [#allocation4], 0 }
   0x4   :  { %17 = vsyncpa [#allocation6], 0  ;;  %s628_s11 = smov [#allocation3]   ;;  %s629_s13 = smov [#allocation5]  }
   0x5   :  { %s26_s12 = sshll.u32 %s628_s11, 4  ;;  %s41_s14 = sshll.u32 %s629_s13, 4  ;;  %s27_s12 = int_to_ptr.vmem [resolvable:$true] %s26_s12  ;;  %s686_s14 = int_to_ptr.vmem [resolvable:$true] %s41_s14 }
   0x6   :  { %s580_s17 = scalar_lea.hbm %s743_s1, 32 }
   0x7   :  { %p581_p0 = scmp.ne.s32.totalorder %s743_s1, %s580_s17  ;;  %p584_p1 = scmp.lt.u32.totalorder %s580_s17, %s743_s1 }
   0x9   :  { %p586_p2 = pnand %p584_p1, %p581_p0 }
   0xb   :  { %589 = shalt.err (!%p586_p2)
}
   0xc   :  { %s590_s21 = scalar_lea.vmem %s27_s12, 32  ;;  %p595_p4 = scmp.lt.s32.totalorder %s27_s12, %s27_s12 }
   0xd   :  { %p591_p3 = scmp.ne.s32.totalorder %s27_s12, %s590_s21  ;;  %p596_p5 = scmp.lt.s32.totalorder %s590_s21, %s590_s21 }
   0xf   :  { %p597_p6 = por %p596_p5, %p595_p4 }
  0x11   :  { %p598_p7 = pnand %p597_p6, %p591_p3 }
  0x13   :  { %601 = shalt.err (!%p598_p7)
}
  0x14   :  { %29 = dma.hbm_to_vmem [thread:$0]  %s743_s1, 32, %s27_s12, [#allocation4]  }
  0x15   :  { %s602_s26 = scalar_lea.hbm %s747_s5, 4096 }
  0x16   :  { %p603_p8 = scmp.ne.s32.totalorder %s747_s5, %s602_s26  ;;  %p606_p9 = scmp.lt.u32.totalorder %s602_s26, %s747_s5 }
  0x18   :  { %p608_p10 = pnand %p606_p9, %p603_p8 }
  0x1a   :  { %611 = shalt.err (!%p608_p10)
}
  0x1b   :  { %s612_s10 = scalar_lea.vmem %s686_s14, 4096  ;;  %p617_p12 = scmp.lt.s32.totalorder %s686_s14, %s686_s14 }
  0x1c   :  { %p613_p11 = scmp.ne.s32.totalorder %s686_s14, %s612_s10  ;;  %p618_p13 = scmp.lt.s32.totalorder %s612_s10, %s612_s10 }
  0x1e   :  { %p619_p0 = por %p618_p13, %p617_p12 }
  0x20   :  { %p620_p1 = pnand %p619_p0, %p613_p11 }
  0x22   :  { %623 = shalt.err (!%p620_p1)
}
  0x23   :  { %s630_s1 = smov 128   ;;  %s631_s11 = smov 8  }
  0x24   :  { %47 = dma.hbm_to_vmem [thread:$0]  %s747_s5, 4096, %s686_s14, [#allocation6], %s630_s1, %s630_s1, %s631_s11  }
  0x25   :  { %624 = dma.done.wait [#allocation4], 32  }
  0x26   :  { %625 = vsyncadd [#allocation4], 4294967264 }
  0x27   :  { %626 = dma.done.wait [#allocation6], 4096  }
  0x28   :  { %627 = vsyncadd [#allocation6], 4294963200  ;;  %v632_v1 = vmov 0   ;;  %vm80_vm0 = vcmask 1041408   ;;  %v64_v3 = vld [vmem:[#allocation3] sm:$0x3]  ;;  %v187_v45 = vlaneseq }
  0x29   :  { %119 = vmatprep.mubr.bf16.mxu1 %v632_v1  ;;  %v485_v2 = vld.sshfl [vmem:[%s745_s3] sm:$0x33 pattern:$0x76325410]  ;;  %vm137_vm1 = vcmask 1043456   ;;  %v65_v11 = vpack.c.bf16 %v64_v3, %v64_v3  ;;  %vm76_vm2 = vcmask 31744  }
  0x2a   :  { %v75_v4 = vcombine.high %v485_v2, %v485_v2  ;;  %v82_v5 = vsel %vm80_vm0, %v485_v2, 0  ;;  %v63_v6 = vld [vmem:[%s744_s2] sm:$0xff]  ;;  %v537_v14 = vld [vmem:[#allocation5 + $0x10] ss:$8 sps:$4 sm:$0xff]   ;;  %vm133_vm3 = vcmask 64512   ;;  %v188_v46 = vshrl.u32 %v187_v45, 7 }
  0x2b   :  { %v489_v7 = vcombine.high %v63_v6, %v63_v6  ;;  %v488_v8 = vcombine.low %v63_v6, %v63_v6  ;;  %v532_v9 = vld [vmem:[#allocation5 + $0x4] ss:$8 sps:$4 sm:$0xff]   ;;  %v534_v10 = vld [vmem:[#allocation5] ss:$8 sps:$4 sm:$0xff]   ;;  %v535_v12 = vld [vmem:[#allocation5 + $0x14] ss:$8 sps:$4 sm:$0xff]  }
  0x2c   :  { %486 = vmatprep.subr.msk.bf16.mxu1 %vm80_vm0, %v75_v4  ;;  %407 = vmatprep.subr.bf16.mxu0 %v532_v9  ;;  %v538_v15 = vld [vmem:[#allocation5 + $0x24] ss:$8 sps:$4 sm:$0xff]   ;;  %v61_v16 = vld [vmem:[%s742_s0] sm:$0x3]  ;;  %v540_v17 = vld [vmem:[#allocation5 + $0x20] ss:$8 sps:$4 sm:$0xff]  }
  0x2d   :  { %88 = vmatpush1.bf16.msra.mxu1 %v82_v5  ;;  %v139_v13 = vsel %vm137_vm1, %v488_v8, 0  ;;  %408 = vmatpush1.bf16.msra.mxu0 %v534_v10  ;;  %v541_v18 = vld [vmem:[#allocation5 + $0x34] ss:$8 sps:$4 sm:$0xff]   ;;  %v62_v19 = vpack.c.bf16 %v61_v16, %v61_v16  ;;  %v543_v20 = vld [vmem:[#allocation5 + $0x30] ss:$8 sps:$4 sm:$0xff]   ;;  %v189_v51 = vsub.s32 0, %v188_v46 }
  0x2e   :  { %490 = vmatprep.subr.msk.bf16.mxu1 %vm137_vm1, %v489_v7  ;;  %409 = vmatprep.subr.bf16.mxu0 %v535_v12  ;;  %v544_v21 = vld [vmem:[#allocation5 + $0x44] ss:$8 sps:$4 sm:$0xff]   ;;  %v546_v22 = vld [vmem:[#allocation5 + $0x40] ss:$8 sps:$4 sm:$0xff]   ;;  %v547_v23 = vld [vmem:[#allocation5 + $0x54] ss:$8 sps:$4 sm:$0xff]  }
  0x2f   :  { %v549_v24 = vld [vmem:[#allocation5 + $0x50] ss:$8 sps:$4 sm:$0xff]   ;;  %v550_v25 = vld [vmem:[#allocation5 + $0x64] ss:$8 sps:$4 sm:$0xff]   ;;  %v552_v26 = vld [vmem:[#allocation5 + $0x60] ss:$8 sps:$4 sm:$0xff]  }
  0x30   :  { %487 = vmatmul.mubr.msk.bf16.vlgmr.msra.gmra.mrb[0].mxu1 %vm76_vm2, %v65_v11  ;;  %v553_v27 = vld [vmem:[#allocation5 + $0x74] ss:$8 sps:$4 sm:$0xff]   ;;  %v555_v28 = vld [vmem:[#allocation5 + $0x70] ss:$8 sps:$4 sm:$0xff]   ;;  %v556_v29 = vld [vmem:[#allocation5 + $0x84] ss:$8 sps:$4 sm:$0xff]  }
  0x31   :  { %145 = vmatpush1.bf16.msra.mxu1 %v139_v13  ;;  %176 = vmatprep.mubr.bf16.mxu1 %v632_v1  ;;  %v558_v30 = vld [vmem:[#allocation5 + $0x80] ss:$8 sps:$4 sm:$0xff]   ;;  %v559_v31 = vld [vmem:[#allocation5 + $0x94] ss:$8 sps:$4 sm:$0xff]   ;;  %v561_v32 = vld [vmem:[#allocation5 + $0x90] ss:$8 sps:$4 sm:$0xff]  }
  0x32   :  { %410 = vmatpush1.bf16.msra.mxu0 %v537_v14  ;;  %v562_v33 = vld [vmem:[#allocation5 + $0xa4] ss:$8 sps:$4 sm:$0xff]   ;;  %v564_v34 = vld [vmem:[#allocation5 + $0xa0] ss:$8 sps:$4 sm:$0xff]   ;;  %v565_v35 = vld [vmem:[#allocation5 + $0xb4] ss:$8 sps:$4 sm:$0xff]  }
  0x33   :  { %411 = vmatprep.subr.bf16.mxu0 %v538_v15  ;;  %v567_v36 = vld [vmem:[#allocation5 + $0xb0] ss:$8 sps:$4 sm:$0xff]   ;;  %v568_v37 = vld [vmem:[#allocation5 + $0xc4] ss:$8 sps:$4 sm:$0xff]   ;;  %v570_v38 = vld [vmem:[#allocation5 + $0xc0] ss:$8 sps:$4 sm:$0xff]  }
  0x34   :  { %v571_v39 = vld [vmem:[#allocation5 + $0xd4] ss:$8 sps:$4 sm:$0xff]   ;;  %v573_v40 = vld [vmem:[#allocation5 + $0xd0] ss:$8 sps:$4 sm:$0xff]   ;;  %v574_v41 = vld [vmem:[#allocation5 + $0xe4] ss:$8 sps:$4 sm:$0xff]  }
  0x35   :  { %v576_v42 = vld [vmem:[#allocation5 + $0xe0] ss:$8 sps:$4 sm:$0xff]   ;;  %v577_v43 = vld [vmem:[#allocation5 + $0xf4] ss:$8 sps:$4 sm:$0xff]   ;;  %v579_v44 = vld [vmem:[#allocation5 + $0xf0] ss:$8 sps:$4 sm:$0xff]  }
  0x36   :  { %412 = vmatpush1.bf16.msra.mxu0 %v540_v17  ;;  %v185_v52 = vld [vmem:[%s746_s4] sm:$0x3]  ;;  %v193_v53 = vsub.s32 1, %v188_v46  ;;  %vm477_vm4 = vcmask 1024  }
  0x37   :  { %413 = vmatprep.subr.bf16.mxu0 %v541_v18  ;;  %v190_v54 = vrot.slane %v185_v52, %v189_v51  ;;  %v235_v4 = vld [vmem:[%s748_s6] sm:$0x3] }
  0x38   :  { %491 = vmatmul.mubr.msk.bf16.vlgmr.msra.gmra.mrb[4].mxu1 %vm133_vm3, %v62_v19  ;;  %v194_v56 = vrot.slane %v185_v52, %v193_v53  ;;  %v240_v5 = vrot.slane %v235_v4, %v189_v51  ;;  %v244_v6 = vrot.slane %v235_v4, %v193_v53  ;;  %v450_v7 = vld [vmem:[%s749_s7] sm:$0x3] }
  0x39   :  { %v455_v11 = vrot.slane %v450_v7, %v189_v51  ;;  %v459_v14 = vrot.slane %v450_v7, %v193_v53 }
  0x3a   :  { %414 = vmatpush1.bf16.msra.mxu0 %v543_v20 }
  0x3b   :  { %415 = vmatprep.subr.bf16.mxu0 %v544_v21 }
  0x3e   :  { %416 = vmatpush1.bf16.msra.mxu0 %v546_v22 }
  0x3f   :  { %417 = vmatprep.subr.bf16.mxu0 %v547_v23  ;;  %v524_v23 = vld [vmem:[#allocation2] ss:$0 sm:$0xff] }
  0x42   :  { %418 = vmatpush1.bf16.msra.mxu0 %v549_v24 }
  0x43   :  { %419 = vmatprep.subr.bf16.mxu0 %v550_v25 }
  0x46   :  { %420 = vmatpush1.bf16.msra.mxu0 %v552_v26 }
  0x47   :  { %421 = vmatprep.subr.bf16.mxu0 %v553_v27 }
  0x4a   :  { %422 = vmatpush1.bf16.msra.mxu0 %v555_v28 }
  0x4b   :  { %423 = vmatprep.subr.bf16.mxu0 %v556_v29 }
  0x4e   :  { %424 = vmatpush1.bf16.msra.mxu0 %v558_v30 }
  0x4f   :  { %425 = vmatprep.subr.bf16.mxu0 %v559_v31 }
  0x52   :  { %426 = vmatpush1.bf16.msra.mxu0 %v561_v32 }
  0x53   :  { %427 = vmatprep.subr.bf16.mxu0 %v562_v33 }
  0x56   :  { %428 = vmatpush1.bf16.msra.mxu0 %v564_v34 }
  0x57   :  { %429 = vmatprep.subr.bf16.mxu0 %v565_v35 }
  0x5a   :  { %430 = vmatpush1.bf16.msra.mxu0 %v567_v36 }
  0x5b   :  { %431 = vmatprep.subr.bf16.mxu0 %v568_v37 }
  0x5e   :  { %432 = vmatpush1.bf16.msra.mxu0 %v570_v38 }
  0x5f   :  { %433 = vmatprep.subr.bf16.mxu0 %v571_v39 }
  0x62   :  { %434 = vmatpush1.bf16.msra.mxu0 %v573_v40 }
  0x63   :  { %435 = vmatprep.subr.bf16.mxu0 %v574_v41 }
  0x66   :  { %436 = vmatpush1.bf16.msra.mxu0 %v576_v42 }
  0x67   :  { %437 = vmatprep.subr.bf16.mxu0 %v577_v43 }
  0x6a   :  { %438 = vmatpush1.bf16.msra.mxu0 %v579_v44 }
 0x103   :  { %v121_v47 = vpop.f32.mrb[0].mxu1 }
 0x104   :  { %v123_v48 = vpop.f32.mrb[1].mxu1 }
 0x105   :  { %v125_v49 = vpop.f32.mrb[2].mxu1 }
 0x106   :  { %v126_v50 = vpop.f32.mrb[3].mxu1 }
 0x10b   :  { %v178_v55 = vpop.f32.mrb[4].mxu1 }
 0x10c   :  { %v179_v57 = vadd.f32 %v178_v55, %v121_v47  ;;  %v180_v58 = vpop.f32.mrb[5].mxu1 }
 0x10d   :  { %v181_v59 = vadd.f32 %v180_v58, %v123_v48  ;;  %v182_v60 = vpop.f32.mrb[6].mxu1 }
 0x10e   :  { %v197_v61 = vadd.f32 %v190_v54, %v179_v57  ;;  %v183_v62 = vpop.f32.mrb[7].mxu1 }
 0x10f   :  { %v198_v63 = vadd.f32 %v194_v56, %v181_v59 }
 0x110   :  { %v199_v0 = vmax.f32 %v197_v61, 0.0 }
 0x111   :  { %v200_v1 = vmax.f32 %v198_v63, 0.0 }
 0x112   :  { %v201_v3 = vpack.c.bf16 %v199_v0, %v199_v0 }
 0x113   :  { %v202_v2 = vpack.c.bf16 %v200_v1, %v200_v1 }
 0x115   :  { %439 = vmatprep.mubr.bf16.mxu0 %v202_v2 }
 0x116   :  { %440 = vmatmul.mubr.bf16.vlgmr.msra.gmra.mrb[0].mxu0 %v201_v3 }
 0x1e9   :  { %v441_v8 = vpop.f32.mrb[0].mxu0 }
 0x1ea   :  { %v442_v9 = vadd.f32 %v441_v8, %v240_v5  ;;  %v443_v10 = vpop.f32.mrb[1].mxu0 }
 0x1eb   :  { %v444_v12 = vadd.f32 %v443_v10, %v244_v6  ;;  %v445_v13 = vpop.f32.mrb[2].mxu0 }
 0x1ec   :  { %v448_v15 = vmax.f32 %v442_v9, 0.0  ;;  %v446_v16 = vpop.f32.mrb[3].mxu0 }
 0x1ed   :  { %v449_v17 = vmax.f32 %v444_v12, 0.0 }
 0x1ee   :  { %v462_v18 = vmul.f32 %v455_v11, %v448_v15 }
 0x1ef   :  { %v463_v19 = vmul.f32 %v459_v14, %v449_v17 }
 0x1f0   :  { %v464_v20 = vsel %vm80_vm0, %v462_v18, 0.0 }
 0x1f1   :  { %v465_v21 = vsel %vm80_vm0, %v463_v19, 0.0 }
 0x1f2   :  { %v466_v22 = vadd.f32 %v465_v21, %v464_v20 }
 0x1f4   :  { %467 = vadd.xlane.f32.xlu0 %v466_v22 }
 0x281   :  { %v468_v24 = vpop.xlane.xlu0 %467 }
 0x282   :  { %v476_v25 = vadd.f32 %v524_v23, %v468_v24 }
 0x284   :  { %478 = vst.msk [vmem:[%s751_s9] sm:$0x3] %vm477_vm4, %v476_v25 }
 0x285   :  { %483 = vsyncpa [#allocation4], 1 }
 0x286   :  { %484 = vsyncpa [#allocation6], 1 }

</bundles_post_ra>
